<compile_context>
chip_gen: v7x
topology: tpu7x:2x2x1
jax: 0.10.0
libtpu: 0.0.40
codegen_flags: <defaults>
</compile_context>

<pallas_src>
import functools
import math

import jax
import jax.numpy as jnp
from jax.experimental import pallas as pl
from jax.experimental.pallas import tpu as pltpu

_INV_SQRT2 = 1.0 / math.sqrt(2.0)
_MASK_NEG = -1e30


def _layernorm(v, g, b, eps=1e-5):
    mu = jnp.mean(v, axis=-1, keepdims=True)
    c = v - mu
    var = jnp.mean(c * c, axis=-1, keepdims=True)
    return c * jax.lax.rsqrt(var + eps) * g + b


def resblock_kernel(x_ref, mask_ref,
                    ln1g, ln1b, wqkv, bqkv, wo, bo,
                    ln2g, ln2b, wfc, bfc, wpj, bpj,
                    o_ref, qkv_scr, ao_scr,
                    *, n_head, use_mask, mlp_chunk_b, approx_recip):
    # x_ref: (Nb, L, D) tile covering Nb batch elements.
    Nb, L, D = x_ref.shape
    hd = D // n_head
    cdt = wqkv.dtype                       # MXU operand dtype (bf16 or f32)
    M = Nb * L

    x = x_ref[...].reshape(M, D).astype(jnp.float32)                # (M, D)

    # ---------------- attention branch ----------------
    h = _layernorm(x, ln1g[0], ln1b[0]).astype(cdt)
    # 1/sqrt(hd) query scale is pre-folded into wqkv/bqkv on the host.
    qkv = jnp.dot(h, wqkv[...], preferred_element_type=jnp.float32) + bqkv[0]
    qkv_scr[...] = qkv.astype(cdt)        # park q/k/v in VMEM (compute dtype)

    for i in range(n_head):
        q_i = qkv_scr[:, i * hd:(i + 1) * hd].reshape(Nb, L, hd)
        k_i = qkv_scr[:, D + i * hd:D + (i + 1) * hd].reshape(Nb, L, hd)
        v_i = qkv_scr[:, 2 * D + i * hd:2 * D + (i + 1) * hd].reshape(Nb, L, hd)
        s = jnp.einsum("bld,bmd->blm", q_i, k_i,
                       preferred_element_type=jnp.float32)          # (Nb, L, L)
        if use_mask:
            s = s + mask_ref[...]          # additive mask (pad cols / attn_mask)
        s = s - jnp.max(s, axis=-1, keepdims=True)
        e = jnp.exp(s)
        den = jnp.sum(e, axis=-1, keepdims=True)
        if approx_recip:
            p = e * pl.reciprocal(den, approx=True)
        else:
            p = e / den
        o_i = jnp.einsum("blm,bmd->bld", p.astype(cdt), v_i,
                         preferred_element_type=jnp.float32)        # (Nb, L, hd)
        # Scratch-concat: write this head's output at its lane offset.
        ao_scr[:, i * hd:(i + 1) * hd] = o_i.reshape(M, hd).astype(cdt)

    # One full-K output projection for all heads.
    attn = jnp.dot(ao_scr[...], wo[...],
                   preferred_element_type=jnp.float32) + bo[0]
    x = x + attn

    # ---------------- MLP branch (row-tiled over batch elements) ----------------
    rows = mlp_chunk_b * L
    for c in range(Nb // mlp_chunk_b):
        xc = x[c * rows:(c + 1) * rows]                              # (rows, D)
        h2 = _layernorm(xc, ln2g[0], ln2b[0]).astype(cdt)
        m = jnp.dot(h2, wfc[...], preferred_element_type=jnp.float32) + bfc[0]
        # exact GELU (matches torch.nn.GELU default), kept in f32
        m = 0.5 * m * (1.0 + jax.lax.erf(m * _INV_SQRT2))
        m = jnp.dot(m.astype(cdt), wpj[...],
                    preferred_element_type=jnp.float32) + bpj[0]
        o_ref[c * mlp_chunk_b:(c + 1) * mlp_chunk_b] = (
            (xc + m).reshape(mlp_chunk_b, L, D).astype(o_ref.dtype))


# Ordered parameter names for one block (weights pre-transposed to
# (in_features, out_features) so the kernel does plain x @ W).
_PARAM_ORDER = ("ln1g", "ln1b", "wqkv", "bqkv", "wo", "bo",
                "ln2g", "ln2b", "wfc", "bfc", "wpj", "bpj")
_WEIGHTS = ("wqkv", "wo", "wfc", "wpj")


def _vmem_capacity_bytes():
    try:
        return int(pltpu.get_tpu_info().vmem_capacity_bytes)
    except Exception:                      # pragma: no cover - conservative fallback
        return 64 * 1024 * 1024            # safe for v5e/v6e/v7x


def _pick_tiles(N, L, D, mlp_w, cdt_size, budget, batch_block, mlp_chunk_bytes):
    """Pick (batch tile Nb, MLP chunk in batch elems) from a VMEM budget."""
    def divisors_desc(n):
        return [d for d in range(n, 0, -1) if n % d == 0]

    def mlp_cb_for(nb):
        for cb in divisors_desc(nb):
            if cb * L * mlp_w * 4 <= mlp_chunk_bytes:
                return cb
        return 1

    def footprint(nb, cb):
        io = 4 * nb * L * D * 4                                   # x in/out, 2 bufs
        wts = (4 * D * D + 2 * D * mlp_w) * cdt_size + (11 * D + 4 * mlp_w) * 4
        scr = 4 * nb * L * D * cdt_size                           # qkv + attn-out scratch
        act = 6 * nb * L * D * 4 + 3 * nb * L * L * 4 + 2 * cb * L * mlp_w * 4
        return io + wts + scr + act + L * L * 4

    if batch_block is not None:
        assert N % batch_block == 0, "batch_block must divide the batch size"
        nb = batch_block
    else:
        # Prefer >= 2 grid steps (keeps both v7x TensorCores busy) and fit budget.
        cap = N if N == 1 else max(1, N // 2)
        nb = 1
        for d in divisors_desc(N):
            if d <= cap and footprint(d, mlp_cb_for(d)) <= budget:
                nb = d
                break
    return nb, mlp_cb_for(nb)


def _cost_estimate(N, L, D, mlp_w, n_head, weight_itemsize):
    matmul_flops = 2 * N * L * D * (3 * D + D + 2 * mlp_w)
    attn_flops = 2 * 2 * N * L * L * D                     # scores + p@v
    transcend = N * n_head * L * L + N * L * mlp_w         # exp + erf
    weight_bytes = (4 * D * D + 2 * D * mlp_w) * weight_itemsize
    act_bytes = 2 * N * L * D * 4
    return pl.CostEstimate(flops=int(matmul_flops + attn_flops),
                           transcendentals=int(transcend),
                           bytes_accessed=int(weight_bytes + act_bytes))


def run_resblock(x_nld, params, n_head, mask, use_mask, *,
                 compute_dtype=jnp.bfloat16, batch_block=None,
                 vmem_limit_bytes=None, mlp_chunk_bytes=8 * 1024 * 1024):
    N, L, D = x_nld.shape
    assert D % n_head == 0
    mlp_w = params["wfc"].shape[1]
    cdt_size = jnp.dtype(compute_dtype).itemsize

    cap = _vmem_capacity_bytes()
    budget = int(cap * 0.7)
    if vmem_limit_bytes is None:
        vmem_limit_bytes = min(int(cap * 0.9), 128 * 1024 * 1024)

    Nb, mlp_cb = _pick_tiles(N, L, D, mlp_w, cdt_size, budget,
                             batch_block, mlp_chunk_bytes)

    # Host-side prep: fold the 1/sqrt(hd) query scale into the q columns of the
    # qkv projection; weights go to the compute dtype, LN params/biases stay f32.
    hd = D // n_head
    scale = 1.0 / math.sqrt(hd)
    prepped = dict(params)
    prepped["wqkv"] = params["wqkv"].at[:, :D].multiply(scale)
    prepped["bqkv"] = params["bqkv"].at[:, :D].multiply(scale)
    plist = [prepped[name].astype(compute_dtype if name in _WEIGHTS else jnp.float32)
             for name in _PARAM_ORDER]

    kernel = functools.partial(
        resblock_kernel, n_head=n_head, use_mask=use_mask, mlp_chunk_b=mlp_cb,
        approx_recip=(jnp.dtype(compute_dtype) != jnp.float32))

    # Weights/biases/mask: whole-array, single VMEM-resident copy (no blocking,
    # no double-buffering, no per-step re-DMA).
    def resident():
        return pl.BlockSpec(memory_space=pltpu.MemorySpace.VMEM)

    in_specs = ([pl.BlockSpec((Nb, L, D), lambda b: (b, 0, 0)), resident()]
                + [resident() for _ in plist])

    return pl.pallas_call(
        kernel,
        out_shape=jax.ShapeDtypeStruct((N, L, D), x_nld.dtype),
        grid=(N // Nb,),
        in_specs=in_specs,
        out_specs=pl.BlockSpec((Nb, L, D), lambda b: (b, 0, 0)),
        scratch_shapes=[pltpu.VMEM((Nb * L, 3 * D), compute_dtype),   # qkv
                        pltpu.VMEM((Nb * L, D), compute_dtype)],      # attn out (heads)
        compiler_params=pltpu.CompilerParams(
            dimension_semantics=("parallel",),
            vmem_limit_bytes=int(vmem_limit_bytes)),
        cost_estimate=_cost_estimate(N, L, D, mlp_w, n_head, cdt_size),
    )(x_nld, mask, *plist)


def transformer_forward(x_lnd, layer_params, n_head, *, attn_mask=None,
                        compute_dtype=jnp.bfloat16, batch_block=None):
    """x_lnd: (L, N, D) like PyTorch (seq, batch, width). attn_mask: additive (L, L)."""
    L, N, D = x_lnd.shape
    x = jnp.transpose(x_lnd, (1, 0, 2))                   # -> (N, L, D)

    # Pad L to a sublane multiple so the in-kernel reshapes/stores are unmasked;
    # pad key columns are removed from the softmax via the additive mask.
    Lp = -(-L // 8) * 8
    padded = Lp != L
    if padded:
        x = jnp.pad(x, ((0, 0), (0, Lp - L), (0, 0)))
    mask = jnp.zeros((Lp, Lp), jnp.float32)
    use_mask = padded or (attn_mask is not None)
    if attn_mask is not None:
        mask = mask.at[:L, :L].set(attn_mask.astype(jnp.float32))
    if padded:
        mask = mask.at[:, L:].set(_MASK_NEG)

    for params in layer_params:
        x = run_resblock(x, params, n_head, mask, use_mask,
                         compute_dtype=compute_dtype, batch_block=batch_block)
    if padded:
        x = x[:, :L]
    return jnp.transpose(x, (1, 0, 2))                    # back to (L, N, D)


# ------------------------- pure-JAX reference -------------------------------
def ref_block(x, p, n_head, mask=None):
    # x: (N, L, D)
    D = x.shape[-1]
    hd = D // n_head
    scale = 1.0 / math.sqrt(hd)
    h = _layernorm(x, p["ln1g"][0], p["ln1b"][0])
    qkv = h @ p["wqkv"] + p["bqkv"][0]
    q, k, v = qkv[..., :D] * scale, qkv[..., D:2 * D], qkv[..., 2 * D:]
    outs = []
    for i in range(n_head):
        sl = slice(i * hd, (i + 1) * hd)
        s = jnp.einsum("nld,nmd->nlm", q[..., sl], k[..., sl])
        if mask is not None:
            s = s + mask
        pattn = jax.nn.softmax(s, axis=-1)
        outs.append(jnp.einsum("nlm,nmd->nld", pattn, v[..., sl]))
    attn = jnp.concatenate(outs, axis=-1) @ p["wo"] + p["bo"][0]
    x = x + attn
    h2 = _layernorm(x, p["ln2g"][0], p["ln2b"][0])
    m = h2 @ p["wfc"] + p["bfc"][0]
    m = 0.5 * m * (1.0 + jax.lax.erf(m * _INV_SQRT2))
    m = m @ p["wpj"] + p["bpj"][0]
    return x + m


def ref_transformer(x_lnd, layer_params, n_head, attn_mask=None):
    x = jnp.transpose(x_lnd, (1, 0, 2))
    for p in layer_params:
        x = ref_block(x, p, n_head, mask=attn_mask)
    return jnp.transpose(x, (1, 0, 2))


# ------------------------- parameter construction ---------------------------
def init_layer_params(key, width, mlp_width):
    ks = jax.random.split(key, 6)
    s = 0.02
    return {
        "ln1g": jnp.ones((1, width), jnp.float32),
        "ln1b": jnp.zeros((1, width), jnp.float32),
        "wqkv": s * jax.random.normal(ks[0], (width, 3 * width), jnp.float32),
        "bqkv": s * jax.random.normal(ks[1], (1, 3 * width), jnp.float32),
        "wo":   s * jax.random.normal(ks[2], (width, width), jnp.float32),
        "bo":   s * jax.random.normal(ks[3], (1, width), jnp.float32),
        "ln2g": jnp.ones((1, width), jnp.float32),
        "ln2b": jnp.zeros((1, width), jnp.float32),
        "wfc":  s * jax.random.normal(ks[4], (width, mlp_width), jnp.float32),
        "bfc":  jnp.zeros((1, mlp_width), jnp.float32),
        "wpj":  s * jax.random.normal(ks[5], (mlp_width, width), jnp.float32),
        "bpj":  jnp.zeros((1, width), jnp.float32),
    }


if __name__ == "__main__":
    root = jax.random.PRNGKey(0)

    # ---- Config A: aligned L, no mask (width=32, layers=2, heads=4, mlp=4x) ----
    width, layers, heads = 32, 2, 4
    mlp_width = int(width * 4.0)
    seq, batch = 8, 2
    kx, k1, k2, kb = jax.random.split(root, 4)

    x = jax.random.normal(kx, (seq, batch, width), jnp.float32)     # (L, N, D)
    layer_params = [init_layer_params(k, width, mlp_width) for k in (k1, k2)]

    ref = ref_transformer(x, layer_params, heads)

    out_f32 = jax.block_until_ready(
        transformer_forward(x, layer_params, heads, compute_dtype=jnp.float32))
    assert out_f32.shape == (seq, batch, width)
    assert jnp.allclose(out_f32, ref, atol=2e-3, rtol=2e-3), "A: f32 kernel mismatch"

    out_bf16 = jax.block_until_ready(
        transformer_forward(x, layer_params, heads, compute_dtype=jnp.bfloat16))
    assert out_bf16.shape == (seq, batch, width)
    assert jnp.allclose(out_bf16, ref, atol=5e-2, rtol=5e-2), "A: bf16 kernel mismatch"

    # ---- Config B: unaligned L (pad + key-mask path) + causal attn_mask ----
    seq_b = 7
    xb = jax.random.normal(kb, (seq_b, batch, width), jnp.float32)
    causal = jnp.where(jnp.tril(jnp.ones((seq_b, seq_b), bool)),
                       0.0, -1e9).astype(jnp.float32)
    params_b = layer_params[:1]

    ref_b = ref_transformer(xb, params_b, heads, attn_mask=causal)

    out_b = jax.block_until_ready(
        transformer_forward(xb, params_b, heads, attn_mask=causal,
                            compute_dtype=jnp.float32))
    assert out_b.shape == (seq_b, batch, width)
    assert jnp.allclose(out_b, ref_b, atol=2e-3, rtol=2e-3), "B: masked f32 mismatch"

    out_b16 = jax.block_until_ready(
        transformer_forward(xb, params_b, heads, attn_mask=causal,
                            compute_dtype=jnp.bfloat16))
    assert jnp.allclose(out_b16, ref_b, atol=5e-2, rtol=5e-2), "B: masked bf16 mismatch"

    print("KERNEL_OK")
</pallas_src>

<mosaic_0001>
module attributes {stable_mosaic.version = 11 : i64} {
  func.func @resblock_kernel(%arg0: i32, %arg1: memref<1x8x32xf32, #tpu.memory_space<vmem>>, %arg2: memref<8x8xf32, #tpu.memory_space<vmem>>, %arg3: memref<1x32xf32, #tpu.memory_space<vmem>>, %arg4: memref<1x32xf32, #tpu.memory_space<vmem>>, %arg5: memref<32x96xf32, #tpu.memory_space<vmem>>, %arg6: memref<1x96xf32, #tpu.memory_space<vmem>>, %arg7: memref<32x32xf32, #tpu.memory_space<vmem>>, %arg8: memref<1x32xf32, #tpu.memory_space<vmem>>, %arg9: memref<1x32xf32, #tpu.memory_space<vmem>>, %arg10: memref<1x32xf32, #tpu.memory_space<vmem>>, %arg11: memref<32x128xf32, #tpu.memory_space<vmem>>, %arg12: memref<1x128xf32, #tpu.memory_space<vmem>>, %arg13: memref<128x32xf32, #tpu.memory_space<vmem>>, %arg14: memref<1x32xf32, #tpu.memory_space<vmem>>, %arg15: memref<1x8x32xf32, #tpu.memory_space<vmem>>, %arg16: memref<8x96xf32, #tpu.memory_space<vmem>>, %arg17: memref<8x32xf32, #tpu.memory_space<vmem>>) attributes {dimension_semantics = [#tpu.dimension_semantics<parallel>], iteration_bounds = array<i64: 2>, scalar_prefetch = 0 : i64, scratch_operands = 2 : i64, tpu.core_type = #tpu.core_type<tc>, window_params = [{transform_indices = @transform_0, window_bounds = array<i64: 1, 8, 32>}, {pipeline_mode = #tpu.pipeline_mode<synchronous>, transform_indices = @transform_1, window_bounds = array<i64: 8, 8>}, {pipeline_mode = #tpu.pipeline_mode<synchronous>, transform_indices = @transform_2, window_bounds = array<i64: 1, 32>}, {pipeline_mode = #tpu.pipeline_mode<synchronous>, transform_indices = @transform_3, window_bounds = array<i64: 1, 32>}, {pipeline_mode = #tpu.pipeline_mode<synchronous>, transform_indices = @transform_4, window_bounds = array<i64: 32, 96>}, {pipeline_mode = #tpu.pipeline_mode<synchronous>, transform_indices = @transform_5, window_bounds = array<i64: 1, 96>}, {pipeline_mode = #tpu.pipeline_mode<synchronous>, transform_indices = @transform_6, window_bounds = array<i64: 32, 32>}, {pipeline_mode = #tpu.pipeline_mode<synchronous>, transform_indices = @transform_7, window_bounds = array<i64: 1, 32>}, {pipeline_mode = #tpu.pipeline_mode<synchronous>, transform_indices = @transform_8, window_bounds = array<i64: 1, 32>}, {pipeline_mode = #tpu.pipeline_mode<synchronous>, transform_indices = @transform_9, window_bounds = array<i64: 1, 32>}, {pipeline_mode = #tpu.pipeline_mode<synchronous>, transform_indices = @transform_10, window_bounds = array<i64: 32, 128>}, {pipeline_mode = #tpu.pipeline_mode<synchronous>, transform_indices = @transform_11, window_bounds = array<i64: 1, 128>}, {pipeline_mode = #tpu.pipeline_mode<synchronous>, transform_indices = @transform_12, window_bounds = array<i64: 128, 32>}, {pipeline_mode = #tpu.pipeline_mode<synchronous>, transform_indices = @transform_13, window_bounds = array<i64: 1, 32>}, {transform_indices = @transform_14, window_bounds = array<i64: 1, 8, 32>}]} {
    %c0 = arith.constant 0 : index
    %c0_0 = arith.constant 0 : index
    %c0_1 = arith.constant 0 : index
    %0 = vector.load %arg1[%c0, %c0_0, %c0_1] : memref<1x8x32xf32, #tpu.memory_space<vmem>>, vector<1x8x32xf32>
    %1 = vector.shape_cast %0 : vector<1x8x32xf32> to vector<8x32xf32>
    %c0_2 = arith.constant 0 : index
    %c0_3 = arith.constant 0 : index
    %2 = vector.load %arg3[%c0_2, %c0_3] : memref<1x32xf32, #tpu.memory_space<vmem>>, vector<1x32xf32>
    %3 = vector.shape_cast %2 : vector<1x32xf32> to vector<32xf32>
    %c0_4 = arith.constant 0 : index
    %c0_5 = arith.constant 0 : index
    %4 = vector.load %arg4[%c0_4, %c0_5] : memref<1x32xf32, #tpu.memory_space<vmem>>, vector<1x32xf32>
    %5 = vector.shape_cast %4 : vector<1x32xf32> to vector<32xf32>
    %cst = arith.constant dense<0.000000e+00> : vector<8xf32>
    %6 = vector.multi_reduction <add>, %1, %cst [1] : vector<8x32xf32> to vector<8xf32>
    %7 = vector.shape_cast %6 : vector<8xf32> to vector<8x1xf32>
    %cst_6 = arith.constant 3.200000e+01 : f32
    %8 = vector.broadcast %cst_6 : f32 to vector<8x1xf32>
    %9 = arith.divf %7, %8 : vector<8x1xf32>
    %10 = vector.broadcast %9 : vector<8x1xf32> to vector<8x32xf32>
    %11 = arith.subf %1, %10 : vector<8x32xf32>
    %12 = arith.mulf %11, %11 : vector<8x32xf32>
    %cst_7 = arith.constant dense<0.000000e+00> : vector<8xf32>
    %13 = vector.multi_reduction <add>, %12, %cst_7 [1] : vector<8x32xf32> to vector<8xf32>
    %14 = vector.shape_cast %13 : vector<8xf32> to vector<8x1xf32>
    %cst_8 = arith.constant 3.200000e+01 : f32
    %15 = vector.broadcast %cst_8 : f32 to vector<8x1xf32>
    %16 = arith.divf %14, %15 : vector<8x1xf32>
    %cst_9 = arith.constant 9.99999974E-6 : f32
    %17 = vector.broadcast %cst_9 : f32 to vector<8x1xf32>
    %18 = arith.addf %16, %17 : vector<8x1xf32>
    %19 = math.rsqrt %18 : vector<8x1xf32>
    %20 = vector.broadcast %19 : vector<8x1xf32> to vector<8x32xf32>
    %21 = arith.mulf %11, %20 : vector<8x32xf32>
    %22 = vector.shape_cast %3 : vector<32xf32> to vector<1x32xf32>
    %23 = vector.broadcast %22 : vector<1x32xf32> to vector<8x32xf32>
    %24 = arith.mulf %21, %23 : vector<8x32xf32>
    %25 = vector.shape_cast %5 : vector<32xf32> to vector<1x32xf32>
    %26 = vector.broadcast %25 : vector<1x32xf32> to vector<8x32xf32>
    %27 = arith.addf %24, %26 : vector<8x32xf32>
    %c0_10 = arith.constant 0 : index
    %c0_11 = arith.constant 0 : index
    %28 = vector.load %arg5[%c0_10, %c0_11] : memref<32x96xf32, #tpu.memory_space<vmem>>, vector<32x96xf32>
    %cst_12 = arith.constant dense<0.000000e+00> : vector<8x96xf32>
    %29 = tpu.matmul %27, %28, %cst_12 {dimension_numbers = #tpu.dot_dimension_numbers<[1], [0], [0], [1], [0, 0, 1, 1], [], []>} : vector<8x32xf32>, vector<32x96xf32>, vector<8x96xf32> -> vector<8x96xf32>
    %c0_13 = arith.constant 0 : index
    %c0_14 = arith.constant 0 : index
    %30 = vector.load %arg6[%c0_13, %c0_14] : memref<1x96xf32, #tpu.memory_space<vmem>>, vector<1x96xf32>
    %31 = vector.shape_cast %30 : vector<1x96xf32> to vector<96xf32>
    %32 = vector.shape_cast %31 : vector<96xf32> to vector<1x96xf32>
    %33 = vector.broadcast %32 : vector<1x96xf32> to vector<8x96xf32>
    %34 = arith.addf %29, %33 : vector<8x96xf32>
    %c0_15 = arith.constant 0 : index
    %c0_16 = arith.constant 0 : index
    %35 = vector.load %arg16[%c0_15, %c0_16] : memref<8x96xf32, #tpu.memory_space<vmem>>, vector<8x96xf32>
    tpu.vector_store %arg16[%c0_15, %c0_16], %34 {strides = array<i32>} : memref<8x96xf32, #tpu.memory_space<vmem>>, vector<8x96xf32>,
    %c0_17 = arith.constant 0 : index
    %c0_18 = arith.constant 0 : index
    %36 = vector.load %arg16[%c0_17, %c0_18] : memref<8x96xf32, #tpu.memory_space<vmem>>, vector<8x8xf32>
    %37 = vector.shape_cast %36 : vector<8x8xf32> to vector<1x8x8xf32>
    %c0_19 = arith.constant 0 : index
    %c32 = arith.constant 32 : index
    %38 = vector.load %arg16[%c0_19, %c32] : memref<8x96xf32, #tpu.memory_space<vmem>>, vector<8x8xf32>
    %39 = vector.shape_cast %38 : vector<8x8xf32> to vector<1x8x8xf32>
    %c0_20 = arith.constant 0 : index
    %c64 = arith.constant 64 : index
    %40 = vector.load %arg16[%c0_20, %c64] : memref<8x96xf32, #tpu.memory_space<vmem>>, vector<8x8xf32>
    %41 = vector.shape_cast %40 : vector<8x8xf32> to vector<1x8x8xf32>
    "tpu.trace_start"() <{level = 10 : i32, message = "bld,bmd->blm"}> : () -> ()
    %cst_21 = arith.constant dense<0.000000e+00> : vector<1x8x8xf32>
    %42 = tpu.matmul %37, %39, %cst_21 {dimension_numbers = #tpu.dot_dimension_numbers<[2], [2], [1], [1], [0, 0, 0, 1, 1, 1], [0], [0]>} : vector<1x8x8xf32>, vector<1x8x8xf32>, vector<1x8x8xf32> -> vector<1x8x8xf32>
    "tpu.trace_stop"() : () -> ()
    %cst_22 = arith.constant dense<0xFF800000> : vector<1x8xf32>
    %43 = vector.multi_reduction <maximumf>, %42, %cst_22 [2] : vector<1x8x8xf32> to vector<1x8xf32>
    %44 = vector.shape_cast %43 : vector<1x8xf32> to vector<1x8x1xf32>
    %45 = vector.broadcast %44 : vector<1x8x1xf32> to vector<1x8x8xf32>
    %46 = arith.subf %42, %45 : vector<1x8x8xf32>
    %47 = math.exp %46 : vector<1x8x8xf32>
    %cst_23 = arith.constant dense<0.000000e+00> : vector<1x8xf32>
    %48 = vector.multi_reduction <add>, %47, %cst_23 [2] : vector<1x8x8xf32> to vector<1x8xf32>
    %49 = vector.shape_cast %48 : vector<1x8xf32> to vector<1x8x1xf32>
    %50 = vector.broadcast %49 : vector<1x8x1xf32> to vector<1x8x8xf32>
    %51 = arith.divf %47, %50 : vector<1x8x8xf32>
    "tpu.trace_start"() <{level = 10 : i32, message = "blm,bmd->bld"}> : () -> ()
    %cst_24 = arith.constant dense<0.000000e+00> : vector<1x8x8xf32>
    %52 = tpu.matmul %51, %41, %cst_24 {dimension_numbers = #tpu.dot_dimension_numbers<[2], [1], [1], [2], [0, 0, 0, 1, 1, 2], [0], [0]>} : vector<1x8x8xf32>, vector<1x8x8xf32>, vector<1x8x8xf32> -> vector<1x8x8xf32>
    "tpu.trace_stop"() : () -> ()
    %53 = vector.shape_cast %52 : vector<1x8x8xf32> to vector<8x8xf32>
    %c0_25 = arith.constant 0 : index
    %c0_26 = arith.constant 0 : index
    %54 = vector.load %arg17[%c0_25, %c0_26] : memref<8x32xf32, #tpu.memory_space<vmem>>, vector<8x8xf32>
    tpu.vector_store %arg17[%c0_25, %c0_26], %53 {strides = array<i32>} : memref<8x32xf32, #tpu.memory_space<vmem>>, vector<8x8xf32>,
    %c0_27 = arith.constant 0 : index
    %c8 = arith.constant 8 : index
    %55 = vector.load %arg16[%c0_27, %c8] : memref<8x96xf32, #tpu.memory_space<vmem>>, vector<8x8xf32>
    %56 = vector.shape_cast %55 : vector<8x8xf32> to vector<1x8x8xf32>
    %c0_28 = arith.constant 0 : index
    %c40 = arith.constant 40 : index
    %57 = vector.load %arg16[%c0_28, %c40] : memref<8x96xf32, #tpu.memory_space<vmem>>, vector<8x8xf32>
    %58 = vector.shape_cast %57 : vector<8x8xf32> to vector<1x8x8xf32>
    %c0_29 = arith.constant 0 : index
    %c72 = arith.constant 72 : index
    %59 = vector.load %arg16[%c0_29, %c72] : memref<8x96xf32, #tpu.memory_space<vmem>>, vector<8x8xf32>
    %60 = vector.shape_cast %59 : vector<8x8xf32> to vector<1x8x8xf32>
    "tpu.trace_start"() <{level = 10 : i32, message = "bld,bmd->blm"}> : () -> ()
    %cst_30 = arith.constant dense<0.000000e+00> : vector<1x8x8xf32>
    %61 = tpu.matmul %56, %58, %cst_30 {dimension_numbers = #tpu.dot_dimension_numbers<[2], [2], [1], [1], [0, 0, 0, 1, 1, 1], [0], [0]>} : vector<1x8x8xf32>, vector<1x8x8xf32>, vector<1x8x8xf32> -> vector<1x8x8xf32>
    "tpu.trace_stop"() : () -> ()
    %cst_31 = arith.constant dense<0xFF800000> : vector<1x8xf32>
    %62 = vector.multi_reduction <maximumf>, %61, %cst_31 [2] : vector<1x8x8xf32> to vector<1x8xf32>
    %63 = vector.shape_cast %62 : vector<1x8xf32> to vector<1x8x1xf32>
    %64 = vector.broadcast %63 : vector<1x8x1xf32> to vector<1x8x8xf32>
    %65 = arith.subf %61, %64 : vector<1x8x8xf32>
    %66 = math.exp %65 : vector<1x8x8xf32>
    %cst_32 = arith.constant dense<0.000000e+00> : vector<1x8xf32>
    %67 = vector.multi_reduction <add>, %66, %cst_32 [2] : vector<1x8x8xf32> to vector<1x8xf32>
    %68 = vector.shape_cast %67 : vector<1x8xf32> to vector<1x8x1xf32>
    %69 = vector.broadcast %68 : vector<1x8x1xf32> to vector<1x8x8xf32>
    %70 = arith.divf %66, %69 : vector<1x8x8xf32>
    "tpu.trace_start"() <{level = 10 : i32, message = "blm,bmd->bld"}> : () -> ()
    %cst_33 = arith.constant dense<0.000000e+00> : vector<1x8x8xf32>
    %71 = tpu.matmul %70, %60, %cst_33 {dimension_numbers = #tpu.dot_dimension_numbers<[2], [1], [1], [2], [0, 0, 0, 1, 1, 2], [0], [0]>} : vector<1x8x8xf32>, vector<1x8x8xf32>, vector<1x8x8xf32> -> vector<1x8x8xf32>
    "tpu.trace_stop"() : () -> ()
    %72 = vector.shape_cast %71 : vector<1x8x8xf32> to vector<8x8xf32>
    %c0_34 = arith.constant 0 : index
    %c8_35 = arith.constant 8 : index
    %73 = vector.load %arg17[%c0_34, %c8_35] : memref<8x32xf32, #tpu.memory_space<vmem>>, vector<8x8xf32>
    tpu.vector_store %arg17[%c0_34, %c8_35], %72 {strides = array<i32>} : memref<8x32xf32, #tpu.memory_space<vmem>>, vector<8x8xf32>,
    %c0_36 = arith.constant 0 : index
    %c16 = arith.constant 16 : index
    %74 = vector.load %arg16[%c0_36, %c16] : memref<8x96xf32, #tpu.memory_space<vmem>>, vector<8x8xf32>
    %75 = vector.shape_cast %74 : vector<8x8xf32> to vector<1x8x8xf32>
    %c0_37 = arith.constant 0 : index
    %c48 = arith.constant 48 : index
    %76 = vector.load %arg16[%c0_37, %c48] : memref<8x96xf32, #tpu.memory_space<vmem>>, vector<8x8xf32>
    %77 = vector.shape_cast %76 : vector<8x8xf32> to vector<1x8x8xf32>
    %c0_38 = arith.constant 0 : index
    %c80 = arith.constant 80 : index
    %78 = vector.load %arg16[%c0_38, %c80] : memref<8x96xf32, #tpu.memory_space<vmem>>, vector<8x8xf32>
    %79 = vector.shape_cast %78 : vector<8x8xf32> to vector<1x8x8xf32>
    "tpu.trace_start"() <{level = 10 : i32, message = "bld,bmd->blm"}> : () -> ()
    %cst_39 = arith.constant dense<0.000000e+00> : vector<1x8x8xf32>
    %80 = tpu.matmul %75, %77, %cst_39 {dimension_numbers = #tpu.dot_dimension_numbers<[2], [2], [1], [1], [0, 0, 0, 1, 1, 1], [0], [0]>} : vector<1x8x8xf32>, vector<1x8x8xf32>, vector<1x8x8xf32> -> vector<1x8x8xf32>
    "tpu.trace_stop"() : () -> ()
    %cst_40 = arith.constant dense<0xFF800000> : vector<1x8xf32>
    %81 = vector.multi_reduction <maximumf>, %80, %cst_40 [2] : vector<1x8x8xf32> to vector<1x8xf32>
    %82 = vector.shape_cast %81 : vector<1x8xf32> to vector<1x8x1xf32>
    %83 = vector.broadcast %82 : vector<1x8x1xf32> to vector<1x8x8xf32>
    %84 = arith.subf %80, %83 : vector<1x8x8xf32>
    %85 = math.exp %84 : vector<1x8x8xf32>
    %cst_41 = arith.constant dense<0.000000e+00> : vector<1x8xf32>
    %86 = vector.multi_reduction <add>, %85, %cst_41 [2] : vector<1x8x8xf32> to vector<1x8xf32>
    %87 = vector.shape_cast %86 : vector<1x8xf32> to vector<1x8x1xf32>
    %88 = vector.broadcast %87 : vector<1x8x1xf32> to vector<1x8x8xf32>
    %89 = arith.divf %85, %88 : vector<1x8x8xf32>
    "tpu.trace_start"() <{level = 10 : i32, message = "blm,bmd->bld"}> : () -> ()
    %cst_42 = arith.constant dense<0.000000e+00> : vector<1x8x8xf32>
    %90 = tpu.matmul %89, %79, %cst_42 {dimension_numbers = #tpu.dot_dimension_numbers<[2], [1], [1], [2], [0, 0, 0, 1, 1, 2], [0], [0]>} : vector<1x8x8xf32>, vector<1x8x8xf32>, vector<1x8x8xf32> -> vector<1x8x8xf32>
    "tpu.trace_stop"() : () -> ()
    %91 = vector.shape_cast %90 : vector<1x8x8xf32> to vector<8x8xf32>
    %c0_43 = arith.constant 0 : index
    %c16_44 = arith.constant 16 : index
    %92 = vector.load %arg17[%c0_43, %c16_44] : memref<8x32xf32, #tpu.memory_space<vmem>>, vector<8x8xf32>
    tpu.vector_store %arg17[%c0_43, %c16_44], %91 {strides = array<i32>} : memref<8x32xf32, #tpu.memory_space<vmem>>, vector<8x8xf32>,
    %c0_45 = arith.constant 0 : index
    %c24 = arith.constant 24 : index
    %93 = vector.load %arg16[%c0_45, %c24] : memref<8x96xf32, #tpu.memory_space<vmem>>, vector<8x8xf32>
    %94 = vector.shape_cast %93 : vector<8x8xf32> to vector<1x8x8xf32>
    %c0_46 = arith.constant 0 : index
    %c56 = arith.constant 56 : index
    %95 = vector.load %arg16[%c0_46, %c56] : memref<8x96xf32, #tpu.memory_space<vmem>>, vector<8x8xf32>
    %96 = vector.shape_cast %95 : vector<8x8xf32> to vector<1x8x8xf32>
    %c0_47 = arith.constant 0 : index
    %c88 = arith.constant 88 : index
    %97 = vector.load %arg16[%c0_47, %c88] : memref<8x96xf32, #tpu.memory_space<vmem>>, vector<8x8xf32>
    %98 = vector.shape_cast %97 : vector<8x8xf32> to vector<1x8x8xf32>
    "tpu.trace_start"() <{level = 10 : i32, message = "bld,bmd->blm"}> : () -> ()
    %cst_48 = arith.constant dense<0.000000e+00> : vector<1x8x8xf32>
    %99 = tpu.matmul %94, %96, %cst_48 {dimension_numbers = #tpu.dot_dimension_numbers<[2], [2], [1], [1], [0, 0, 0, 1, 1, 1], [0], [0]>} : vector<1x8x8xf32>, vector<1x8x8xf32>, vector<1x8x8xf32> -> vector<1x8x8xf32>
    "tpu.trace_stop"() : () -> ()
    %cst_49 = arith.constant dense<0xFF800000> : vector<1x8xf32>
    %100 = vector.multi_reduction <maximumf>, %99, %cst_49 [2] : vector<1x8x8xf32> to vector<1x8xf32>
    %101 = vector.shape_cast %100 : vector<1x8xf32> to vector<1x8x1xf32>
    %102 = vector.broadcast %101 : vector<1x8x1xf32> to vector<1x8x8xf32>
    %103 = arith.subf %99, %102 : vector<1x8x8xf32>
    %104 = math.exp %103 : vector<1x8x8xf32>
    %cst_50 = arith.constant dense<0.000000e+00> : vector<1x8xf32>
    %105 = vector.multi_reduction <add>, %104, %cst_50 [2] : vector<1x8x8xf32> to vector<1x8xf32>
    %106 = vector.shape_cast %105 : vector<1x8xf32> to vector<1x8x1xf32>
    %107 = vector.broadcast %106 : vector<1x8x1xf32> to vector<1x8x8xf32>
    %108 = arith.divf %104, %107 : vector<1x8x8xf32>
    "tpu.trace_start"() <{level = 10 : i32, message = "blm,bmd->bld"}> : () -> ()
    %cst_51 = arith.constant dense<0.000000e+00> : vector<1x8x8xf32>
    %109 = tpu.matmul %108, %98, %cst_51 {dimension_numbers = #tpu.dot_dimension_numbers<[2], [1], [1], [2], [0, 0, 0, 1, 1, 2], [0], [0]>} : vector<1x8x8xf32>, vector<1x8x8xf32>, vector<1x8x8xf32> -> vector<1x8x8xf32>
    "tpu.trace_stop"() : () -> ()
    %110 = vector.shape_cast %109 : vector<1x8x8xf32> to vector<8x8xf32>
    %c0_52 = arith.constant 0 : index
    %c24_53 = arith.constant 24 : index
    %111 = vector.load %arg17[%c0_52, %c24_53] : memref<8x32xf32, #tpu.memory_space<vmem>>, vector<8x8xf32>
    tpu.vector_store %arg17[%c0_52, %c24_53], %110 {strides = array<i32>} : memref<8x32xf32, #tpu.memory_space<vmem>>, vector<8x8xf32>,
    %c0_54 = arith.constant 0 : index
    %c0_55 = arith.constant 0 : index
    %112 = vector.load %arg17[%c0_54, %c0_55] : memref<8x32xf32, #tpu.memory_space<vmem>>, vector<8x32xf32>
    %c0_56 = arith.constant 0 : index
    %c0_57 = arith.constant 0 : index
    %113 = vector.load %arg7[%c0_56, %c0_57] : memref<32x32xf32, #tpu.memory_space<vmem>>, vector<32x32xf32>
    %cst_58 = arith.constant dense<0.000000e+00> : vector<8x32xf32>
    %114 = tpu.matmul %112, %113, %cst_58 {dimension_numbers = #tpu.dot_dimension_numbers<[1], [0], [0], [1], [0, 0, 1, 1], [], []>} : vector<8x32xf32>, vector<32x32xf32>, vector<8x32xf32> -> vector<8x32xf32>
    %c0_59 = arith.constant 0 : index
    %c0_60 = arith.constant 0 : index
    %115 = vector.load %arg8[%c0_59, %c0_60] : memref<1x32xf32, #tpu.memory_space<vmem>>, vector<1x32xf32>
    %116 = vector.shape_cast %115 : vector<1x32xf32> to vector<32xf32>
    %117 = vector.shape_cast %116 : vector<32xf32> to vector<1x32xf32>
    %118 = vector.broadcast %117 : vector<1x32xf32> to vector<8x32xf32>
    %119 = arith.addf %114, %118 : vector<8x32xf32>
    %120 = arith.addf %1, %119 : vector<8x32xf32>
    %c0_61 = arith.constant 0 : index
    %c0_62 = arith.constant 0 : index
    %121 = vector.load %arg9[%c0_61, %c0_62] : memref<1x32xf32, #tpu.memory_space<vmem>>, vector<1x32xf32>
    %122 = vector.shape_cast %121 : vector<1x32xf32> to vector<32xf32>
    %c0_63 = arith.constant 0 : index
    %c0_64 = arith.constant 0 : index
    %123 = vector.load %arg10[%c0_63, %c0_64] : memref<1x32xf32, #tpu.memory_space<vmem>>, vector<1x32xf32>
    %124 = vector.shape_cast %123 : vector<1x32xf32> to vector<32xf32>
    %cst_65 = arith.constant dense<0.000000e+00> : vector<8xf32>
    %125 = vector.multi_reduction <add>, %120, %cst_65 [1] : vector<8x32xf32> to vector<8xf32>
    %126 = vector.shape_cast %125 : vector<8xf32> to vector<8x1xf32>
    %cst_66 = arith.constant 3.200000e+01 : f32
    %127 = vector.broadcast %cst_66 : f32 to vector<8x1xf32>
    %128 = arith.divf %126, %127 : vector<8x1xf32>
    %129 = vector.broadcast %128 : vector<8x1xf32> to vector<8x32xf32>
    %130 = arith.subf %120, %129 : vector<8x32xf32>
    %131 = arith.mulf %130, %130 : vector<8x32xf32>
    %cst_67 = arith.constant dense<0.000000e+00> : vector<8xf32>
    %132 = vector.multi_reduction <add>, %131, %cst_67 [1] : vector<8x32xf32> to vector<8xf32>
    %133 = vector.shape_cast %132 : vector<8xf32> to vector<8x1xf32>
    %cst_68 = arith.constant 3.200000e+01 : f32
    %134 = vector.broadcast %cst_68 : f32 to vector<8x1xf32>
    %135 = arith.divf %133, %134 : vector<8x1xf32>
    %cst_69 = arith.constant 9.99999974E-6 : f32
    %136 = vector.broadcast %cst_69 : f32 to vector<8x1xf32>
    %137 = arith.addf %135, %136 : vector<8x1xf32>
    %138 = math.rsqrt %137 : vector<8x1xf32>
    %139 = vector.broadcast %138 : vector<8x1xf32> to vector<8x32xf32>
    %140 = arith.mulf %130, %139 : vector<8x32xf32>
    %141 = vector.shape_cast %122 : vector<32xf32> to vector<1x32xf32>
    %142 = vector.broadcast %141 : vector<1x32xf32> to vector<8x32xf32>
    %143 = arith.mulf %140, %142 : vector<8x32xf32>
    %144 = vector.shape_cast %124 : vector<32xf32> to vector<1x32xf32>
    %145 = vector.broadcast %144 : vector<1x32xf32> to vector<8x32xf32>
    %146 = arith.addf %143, %145 : vector<8x32xf32>
    %c0_70 = arith.constant 0 : index
    %c0_71 = arith.constant 0 : index
    %147 = vector.load %arg11[%c0_70, %c0_71] : memref<32x128xf32, #tpu.memory_space<vmem>>, vector<32x128xf32>
    %cst_72 = arith.constant dense<0.000000e+00> : vector<8x128xf32>
    %148 = tpu.matmul %146, %147, %cst_72 {dimension_numbers = #tpu.dot_dimension_numbers<[1], [0], [0], [1], [0, 0, 1, 1], [], []>} : vector<8x32xf32>, vector<32x128xf32>, vector<8x128xf32> -> vector<8x128xf32>
    %c0_73 = arith.constant 0 : index
    %c0_74 = arith.constant 0 : index
    %149 = vector.load %arg12[%c0_73, %c0_74] : memref<1x128xf32, #tpu.memory_space<vmem>>, vector<1x128xf32>
    %150 = vector.shape_cast %149 : vector<1x128xf32> to vector<128xf32>
    %151 = vector.shape_cast %150 : vector<128xf32> to vector<1x128xf32>
    %152 = vector.broadcast %151 : vector<1x128xf32> to vector<8x128xf32>
    %153 = arith.addf %148, %152 : vector<8x128xf32>
    %cst_75 = arith.constant 5.000000e-01 : f32
    %154 = vector.broadcast %cst_75 : f32 to vector<8x128xf32>
    %155 = arith.mulf %154, %153 : vector<8x128xf32>
    %cst_76 = arith.constant 0.707106769 : f32
    %156 = vector.broadcast %cst_76 : f32 to vector<8x128xf32>
    %157 = arith.mulf %153, %156 : vector<8x128xf32>
    %158 = math.erf %157 : vector<8x128xf32>
    %cst_77 = arith.constant 1.000000e+00 : f32
    %159 = vector.broadcast %cst_77 : f32 to vector<8x128xf32>
    %160 = arith.addf %159, %158 : vector<8x128xf32>
    %161 = arith.mulf %155, %160 : vector<8x128xf32>
    %c0_78 = arith.constant 0 : index
    %c0_79 = arith.constant 0 : index
    %162 = vector.load %arg13[%c0_78, %c0_79] : memref<128x32xf32, #tpu.memory_space<vmem>>, vector<128x32xf32>
    %cst_80 = arith.constant dense<0.000000e+00> : vector<8x32xf32>
    %163 = tpu.matmul %161, %162, %cst_80 {dimension_numbers = #tpu.dot_dimension_numbers<[1], [0], [0], [1], [0, 0, 1, 1], [], []>} : vector<8x128xf32>, vector<128x32xf32>, vector<8x32xf32> -> vector<8x32xf32>
    %c0_81 = arith.constant 0 : index
    %c0_82 = arith.constant 0 : index
    %164 = vector.load %arg14[%c0_81, %c0_82] : memref<1x32xf32, #tpu.memory_space<vmem>>, vector<1x32xf32>
    %165 = vector.shape_cast %164 : vector<1x32xf32> to vector<32xf32>
    %166 = vector.shape_cast %165 : vector<32xf32> to vector<1x32xf32>
    %167 = vector.broadcast %166 : vector<1x32xf32> to vector<8x32xf32>
    %168 = arith.addf %163, %167 : vector<8x32xf32>
    %169 = arith.addf %120, %168 : vector<8x32xf32>
    %170 = vector.shape_cast %169 : vector<8x32xf32> to vector<1x8x32xf32>
    %c0_83 = arith.constant 0 : index
    %c0_84 = arith.constant 0 : index
    %c0_85 = arith.constant 0 : index
    %171 = vector.load %arg15[%c0_83, %c0_84, %c0_85] : memref<1x8x32xf32, #tpu.memory_space<vmem>>, vector<1x8x32xf32>
    tpu.vector_store %arg15[%c0_83, %c0_84, %c0_85], %170 {strides = array<i32>} : memref<1x8x32xf32, #tpu.memory_space<vmem>>, vector<1x8x32xf32>,
    return
  }
  func.func @transform_0(%arg0: i32) -> (i32, i32, i32) {
    %c0_i32 = arith.constant 0 : i32
    %c0_i32_0 = arith.constant 0 : i32
    %c0_i32_1 = arith.constant 0 : i32
    return %arg0, %c0_i32, %c0_i32_0 : i32, i32, i32
  }
  func.func @transform_1(%arg0: i32) -> (i32, i32) {
    %c0_i32 = arith.constant 0 : i32
    %c0_i32_0 = arith.constant 0 : i32
    %c0_i32_1 = arith.constant 0 : i32
    return %c0_i32, %c0_i32_0 : i32, i32
  }
  func.func @transform_2(%arg0: i32) -> (i32, i32) {
    %c0_i32 = arith.constant 0 : i32
    %c0_i32_0 = arith.constant 0 : i32
    %c0_i32_1 = arith.constant 0 : i32
    return %c0_i32, %c0_i32_0 : i32, i32
  }
  func.func @transform_3(%arg0: i32) -> (i32, i32) {
    %c0_i32 = arith.constant 0 : i32
    %c0_i32_0 = arith.constant 0 : i32
    %c0_i32_1 = arith.constant 0 : i32
    return %c0_i32, %c0_i32_0 : i32, i32
  }
  func.func @transform_4(%arg0: i32) -> (i32, i32) {
    %c0_i32 = arith.constant 0 : i32
    %c0_i32_0 = arith.constant 0 : i32
    %c0_i32_1 = arith.constant 0 : i32
    return %c0_i32, %c0_i32_0 : i32, i32
  }
  func.func @transform_5(%arg0: i32) -> (i32, i32) {
    %c0_i32 = arith.constant 0 : i32
    %c0_i32_0 = arith.constant 0 : i32
    %c0_i32_1 = arith.constant 0 : i32
    return %c0_i32, %c0_i32_0 : i32, i32
  }
  func.func @transform_6(%arg0: i32) -> (i32, i32) {
    %c0_i32 = arith.constant 0 : i32
    %c0_i32_0 = arith.constant 0 : i32
    %c0_i32_1 = arith.constant 0 : i32
    return %c0_i32, %c0_i32_0 : i32, i32
  }
  func.func @transform_7(%arg0: i32) -> (i32, i32) {
    %c0_i32 = arith.constant 0 : i32
    %c0_i32_0 = arith.constant 0 : i32
    %c0_i32_1 = arith.constant 0 : i32
    return %c0_i32, %c0_i32_0 : i32, i32
  }
  func.func @transform_8(%arg0: i32) -> (i32, i32) {
    %c0_i32 = arith.constant 0 : i32
    %c0_i32_0 = arith.constant 0 : i32
    %c0_i32_1 = arith.constant 0 : i32
    return %c0_i32, %c0_i32_0 : i32, i32
  }
  func.func @transform_9(%arg0: i32) -> (i32, i32) {
    %c0_i32 = arith.constant 0 : i32
    %c0_i32_0 = arith.constant 0 : i32
    %c0_i32_1 = arith.constant 0 : i32
    return %c0_i32, %c0_i32_0 : i32, i32
  }
  func.func @transform_10(%arg0: i32) -> (i32, i32) {
    %c0_i32 = arith.constant 0 : i32
    %c0_i32_0 = arith.constant 0 : i32
    %c0_i32_1 = arith.constant 0 : i32
    return %c0_i32, %c0_i32_0 : i32, i32
  }
  func.func @transform_11(%arg0: i32) -> (i32, i32) {
    %c0_i32 = arith.constant 0 : i32
    %c0_i32_0 = arith.constant 0 : i32
    %c0_i32_1 = arith.constant 0 : i32
    return %c0_i32, %c0_i32_0 : i32, i32
  }
  func.func @transform_12(%arg0: i32) -> (i32, i32) {
    %c0_i32 = arith.constant 0 : i32
    %c0_i32_0 = arith.constant 0 : i32
    %c0_i32_1 = arith.constant 0 : i32
    return %c0_i32, %c0_i32_0 : i32, i32
  }
  func.func @transform_13(%arg0: i32) -> (i32, i32) {
    %c0_i32 = arith.constant 0 : i32
    %c0_i32_0 = arith.constant 0 : i32
    %c0_i32_1 = arith.constant 0 : i32
    return %c0_i32, %c0_i32_0 : i32, i32
  }
  func.func @transform_14(%arg0: i32) -> (i32, i32, i32) {
    %c0_i32 = arith.constant 0 : i32
    %c0_i32_0 = arith.constant 0 : i32
    %c0_i32_1 = arith.constant 0 : i32
    return %arg0, %c0_i32, %c0_i32_0 : i32, i32, i32
  }
}

</mosaic_0001>

<bundles_post_ra>
// kernel: tpu_custom_call.1
= control target key start
LH: loop header
LB: loop body
LE: loop exit
PB: predicated region body
PF: predicated region fallthrough
CT: control target
= control target key end

     0   :  { %s2412_s0 = inlined_call_operand.vmem [shape: f32[2,8,32], index: 0, kind: input, shape index: {}]   ;;  %s2413_s1 = inlined_call_operand.vmem [shape: f32[8,8], index: 1, kind: input, shape index: {}]   ;;  %s2414_s2 = inlined_call_operand.vmem [shape: f32[1,32], index: 2, kind: input, shape index: {}]   ;;  %s2415_s3 = inlined_call_operand.vmem [shape: f32[1,32], index: 3, kind: input, shape index: {}]   ;;  %s2416_s4 = inlined_call_operand.vmem [shape: f32[32,96], index: 4, kind: input, shape index: {}]   ;;  %s2417_s5 = inlined_call_operand.vmem [shape: f32[1,96], index: 5, kind: input, shape index: {}]   ;;  %s2418_s6 = inlined_call_operand.vmem [shape: f32[32,32], index: 6, kind: input, shape index: {}]   ;;  %s2419_s7 = inlined_call_operand.vmem [shape: f32[1,32], index: 7, kind: input, shape index: {}]   ;;  %s2420_s8 = inlined_call_operand.vmem [shape: f32[1,32], index: 8, kind: input, shape index: {}]   ;;  %s2421_s9 = inlined_call_operand.vmem [shape: f32[1,32], index: 9, kind: input, shape index: {}]   ;;  %s2422_s10 = inlined_call_operand.vmem [shape: f32[32,128], index: 10, kind: input, shape index: {}]   ;;  %s2423_s11 = inlined_call_operand.vmem [shape: f32[1,128], index: 11, kind: input, shape index: {}]   ;;  %s2424_s12 = inlined_call_operand.vmem [shape: f32[128,32], index: 12, kind: input, shape index: {}]   ;;  %s2425_s13 = inlined_call_operand.vmem [shape: f32[1,32], index: 13, kind: input, shape index: {}]   ;;  %s2426_s14 = inlined_call_operand.hbm [shape: f32[2,8,32], index: 14, kind: output, shape index: {}]  }
   0x1   :  { %2427 = sst [smem:[#allocation7_spill]] %s2412_s0 }
   0x2   :  { %2428 = sst [smem:[#allocation8_spill]] %s2414_s2 }
   0x3   :  { %2429 = sst [smem:[#allocation9_spill]] %s2415_s3 }
   0x4   :  { %19 = vsyncpa [#allocation5], 0 }
   0x5   :  { %21 = vsyncpa [#allocation5 + $0x1], 0  ;;  %s2105_s28 = smov 0   ;;  %s2107_s29 = smov 0  }
   0x6   :  { %s2109_s30 = smov 0   ;;  %s2111_s15 = smov 0  }
   0x7 LB: > { %s2126_s1 = sadd.s32 4294967295, %s2010_s15   ;;  %s1639_s16 = sadd.s32 4294967294, %s2010_s15   ;;  %s2010_s15 = sphi %s2111_s15, %s2438_s15   ;;  %s2006_s30 = sphi %s2109_s30, %s2437_s30   ;;  %s2002_s29 = sphi %s2107_s29, %s2436_s29   ;;  %s1998_s28 = sphi %s2105_s28, %s2435_s28  }
   0x8   : > { %s2130_s17 = sadd.s32 1, %s2010_s15   ;;  %s333_s18 = sadd.s32 1, %s2006_s30 }
   0x9   : > { %s330_s19 = ssub.s32 %s2010_s15, %s2130_s17  ;;  %p343_p0 = scmp.ne.s32.totalorder %s2006_s30, %s2002_s29 }
   0xa   : > { %p331_p1 = scmp.eq.s32.totalorder %s330_s19, 0  ;;  %p344_p2 = scmp.eq.s32.totalorder %s2126_s1, 1 }
   0xb   : > { %p349_p3 = scmp.ne.s32.totalorder %s2002_s29, %s1998_s28  ;;  %p350_p4 = scmp.eq.s32.totalorder %s1639_s16, 1 }
   0xc   : > { %s2141_s20 = scalar_select %p331_p1, %s2006_s30, %s333_s18  }
   0xd   : > { %p2143_p5 = por %p344_p2, %p343_p0  ;;  %p2147_p6 = por %p350_p4, %p349_p3 }
   0xe   : > { %p1642_p7 = scmp.ge.s32.totalorder %s2010_s15, 1  ;;  %p414_p8 = scmp.lt.s32.totalorder %s2010_s15, 3 }
  0x10   : > { %p415_p9 = pnand %p1642_p7, %p414_p8 }
  0x11   : > { %p459_p10 = scmp.lt.s32.totalorder (!%p415_p9), %s2126_s1, 1  ;;  %vm466_vm0 = vcmask (!%p415_p9), 261120   ;;  %s2432_s0 = sld [smem:[#allocation7_spill]] (!%p415_p9)  ;;  %v495_v7 = vld [vmem:[%s2416_s4] sm:$0xff] (!%p415_p9)  ;;  %v496_v8 = vld [vmem:[%s2416_s4 + $0x8] sm:$0xff] (!%p415_p9)  ;;  %v497_v9 = vld [vmem:[%s2416_s4 + $0x10] sm:$0xff] (!%p415_p9) }
  0x12   : > { %418 = sbr.rel (%p415_p9) target bundleno = 2551 (0x9f7), region = 76  ;;  %v2012_v10 = vmov (!%p415_p9), 0.0|0.0   ;;  %v1829_v11 = vpack.c.bf16 (!%p415_p9), %v496_v8, %v495_v7  ;;  %v498_v12 = vld [vmem:[%s2416_s4 + $0x18] sm:$0xff] (!%p415_p9)  ;;  %vm2013_vm1 = vmmov (!%p415_p9), 0   ;;  %v2014_v13 = vmov (!%p415_p9), 0.0   ;;  %s2433_s2 = sld [smem:[#allocation8_spill]] (!%p415_p9) }
  0x13   : > { %1828 = vmatprep.subr.bf16.mxu1 (!%p415_p9), %v2012_v10  ;;  %1728 = vmatprep.mubr.msk.f32.mxu1 (!%p415_p9), %vm2013_vm1, %v2014_v13  ;;  %v1832_v14 = vpack.c.bf16 (!%p415_p9), %v498_v12, %v497_v9  ;;  %s2434_s3 = sld [smem:[#allocation9_spill]] (!%p415_p9)  ;;  %v1647_v24 = vld [vmem:[%s2417_s5] ss:$0 sm:$0xff] (!%p415_p9)  ;;  %vm579_vm2 = vcmask (!%p415_p9), 785408   ;;  %s2015_s26 = smov (!%p415_p9), 120   ;;  %vm585_vm3 = vcmask (!%p415_p9), 64512  }
  0x14   : > { %1741 = vmatprep.subr.mxu0 (!%p415_p9), %v2014_v13  ;;  %1743 = vmatprep.mubr.msk.f32.mxu0 (!%p415_p9), %vm2013_vm1, %v2014_v13  ;;  %s2017_s16 = smov (!%p415_p9), 88   ;;  %s2018_s18 = smov (!%p415_p9), 80   ;;  %vm919_vm4 = vcmask (!%p415_p9), 130112   ;;  %vm1092_vm5 = vcmask (!%p415_p9), 195712   ;;  %vm1265_vm6 = vcmask (!%p415_p9), 261312  }
  0x15   : > { %1830 = vmatpush3.bf16.msra.mxu1 (!%p415_p9), %v1829_v11  ;;  %s2019_s19 = smov (!%p415_p9), 112   ;;  %s2022_s25 = smov (!%p415_p9), 64  }
  0x16   : > { %1831 = vmatprep.subr.bf16.mxu1 (!%p415_p9), %v2012_v10 }
  0x18   : > { %v1645_v19 = vld [vmem:[%s2433_s2] ss:$0 sm:$0xff] (!%p415_p9) }
  0x19   : > { %s460_s23 = scalar_select %p459_p10, %s2126_s1, 1  ;;  %1833 = vmatpush3.bf16.msra.mxu1 %v1832_v14  ;;  %v1646_v21 = vld [vmem:[%s2434_s3] ss:$0 sm:$0xff] }
  0x1a   : > { %1731 = vmatprep.subr.mxu1 %v2014_v13 }
  0x1b   : > { %s1644_s24 = sshll.u32 %s460_s23, 3  ;;  %s2020_s23 = smov 72  }
  0x1c   : > { %s462_s27 = scalar_lea.vmem %s2432_s0, %s1644_s24  ;;  %s2021_s24 = smov 104  }
  0x1d   : > { %v2158_v0 = vld [vmem:[%s462_s27] sm:$0xff]  ;;  %s2016_s27 = smov 96   ;;  %s1669_s0 = sshll.u32 %s2126_s1, 7 }
  0x1e   : > { %v467_v1 = vsel %vm466_vm0, %v2158_v0, 0.0 }
  0x1f   : > { %468 = vadd.xlane.f32.xlu0 %v467_v1 }
  0xac   : > { %v469_v2 = vpop.xlane.xlu0 %468 }
  0xad   : > { %v471_v3 = vmul.f32 0.03125, %v469_v2 }
  0xaf   : > { %v472_v4 = vsub.f32 %v2158_v0, %v471_v3 }
  0xb1   : > { %v473_v5 = vmul.f32 %v472_v4, %v472_v4 }
  0xb3   : > { %v474_v6 = vsel %vm466_vm0, %v473_v5, 0.0 }
  0xb4   : > { %475 = vadd.xlane.f32.xlu0 %v474_v6 }
 0x141   : > { %v476_v15 = vpop.xlane.xlu0 %475 }
 0x142   : > { %v477_v16 = vmul.f32 0.03125, %v476_v15 }
 0x144   : > { %v478_v17 = vadd.f32 1e-05, %v477_v16 }
 0x146   : > { %1926 = vrsqrt.f32 %v478_v17 }
 0x150   : > { %v1927_v18 = vpop.eup %1926 }
 0x151   : > { %v480_v20 = vmul.f32 %v1927_v18, %v472_v4 }
 0x153   : > { %v487_v22 = vmul.f32 %v1645_v19, %v480_v20 }
 0x155   : > { %v494_v23 = vadd.f32 %v1646_v21, %v487_v22 }
 0x157   : > { %1729 = vmatmul.mubr.msk.f32.vlgmr.msra.gmra.mrb[0].mxu1 %vm466_vm0, %v494_v23 }
 0x158   : > { %1733 = vmatprep.mubr.msk.f32.mxu1 %vm2013_vm1, %v2014_v13 }
 0x22a   : > { %v575_v25 = vpop.f32.mrb[0].mxu1 }
 0x22b   : > { %v576_v26 = vadd.f32 %v1647_v24, %v575_v25  ;;  %v1730_v27 = vpop.f32.mrb[1].mxu1  ;;  %v1268_v25 = vld [vmem:[%s2418_s6] sm:$0xff] }
 0x22d   : > { %580 = vst.msk [vmem:[#allocation2] sm:$0xff] %vm579_vm2, %v576_v26  ;;  %v1269_v26 = vld [vmem:[%s2418_s6 + $0x8] sm:$0xff] }
 0x22e   : > { %v1835_v27 = vpack.c.bf16 %v1269_v26, %v1268_v25  ;;  %v1485_v25 = vld [vmem:[%s2424_s12 + $0x70] sm:$0xff]  ;;  %v1486_v26 = vld [vmem:[%s2424_s12 + $0x78] sm:$0xff] }
 0x234   : > { %v2196_v28 = vld [vmem:[#allocation2] sm:$0xff] }
 0x235   : > { %750 = vrot.lane.b32.xlu0 %v2196_v28, %s2015_s26  ;;  %583 = vrot.lane.b32.xlu1 %v2196_v28, %s2016_s27  ;;  %s2023_s26 = smov 48   ;;  %s2024_s27 = smov 40  }
 0x239   : > { %752 = vrot.lane.b32.xlu1 %v2196_v28, %s2017_s16  ;;  %s2025_s16 = smov 56  }
 0x23d   : > { %925 = vrot.lane.b32.xlu1 %v2196_v28, %s2018_s18  ;;  %s2026_s18 = smov 8  }
 0x241   : > { %923 = vrot.lane.b32.xlu1 %v2196_v28, %s2019_s19  ;;  %s2027_s19 = smov 16  }
 0x245   : > { %1098 = vrot.lane.b32.xlu1 %v2196_v28, %s2020_s23  ;;  %s2028_s23 = smov 24  }
 0x249   : > { %1096 = vrot.lane.b32.xlu1 %v2196_v28, %s2021_s24  ;;  %s456_s24 = sand.u32 1, %s2002_s29  }
 0x2a7   : > { %v584_v29 = vpop.permute.xlu1 %583  ;;  %v751_v31 = vpop.permute.xlu0 %750 }
 0x2a8   : > { %1732 = vmatpush3.xpose.msk.msra.mxu1 %vm585_vm3, %v584_v29  ;;  %v1271_v29 = vld [vmem:[%s2418_s6 + $0x18] sm:$0xff] }
 0x2a9   : > { %1736 = vmatprep.subr.mxu1 %v2014_v13 }
 0x2ab   : > { %1734 = vmatmul.mubr.msk.f32.vlgmr.msra.gmra.mrb[2].mxu1 %vm585_vm3, %v2196_v28  ;;  %v753_v30 = vpop.permute.xlu1 %752 }
 0x2ac   : > { %1742 = vmatpush3.xpose.msk.msra.mxu0 %vm585_vm3, %v753_v30  ;;  %1738 = vmatprep.mubr.msk.f32.mxu1 %vm2013_vm1, %v2014_v13 }
 0x2ad   : > { %1751 = vmatprep.subr.mxu0 %v2014_v13 }
 0x2af   : > { %1744 = vmatmul.mubr.msk.f32.vlgmr.msra.gmra.mrb[0].mxu0 %vm585_vm3, %v751_v31  ;;  %v926_v32 = vpop.permute.xlu1 %925 }
 0x2b0   : > { %1752 = vmatpush3.xpose.msk.msra.mxu0 %vm585_vm3, %v926_v32  ;;  %1753 = vmatprep.mubr.msk.f32.mxu0 %vm2013_vm1, %v2014_v13 }
 0x2b1   : > { %1761 = vmatprep.subr.mxu0 %v2014_v13 }
 0x2b3   : > { %v924_v33 = vpop.permute.xlu1 %923 }
 0x2b4   : > { %1754 = vmatmul.mubr.msk.f32.vlgmr.msra.gmra.mrb[2].mxu0 %vm585_vm3, %v924_v33 }
 0x2b5   : > { %1763 = vmatprep.mubr.msk.f32.mxu0 %vm2013_vm1, %v2014_v13 }
 0x2b7   : > { %v1099_v34 = vpop.permute.xlu1 %1098 }
 0x2b8   : > { %1762 = vmatpush3.xpose.msk.msra.mxu0 %vm585_vm3, %v1099_v34 }
 0x2b9   : > { %1846 = vmatprep.subr.bf16.mxu0 %v2012_v10 }
 0x2bb   : > { %v1097_v35 = vpop.permute.xlu1 %1096 }
 0x2bc   : > { %1764 = vmatmul.mubr.msk.f32.vlgmr.msra.gmra.mrb[4].mxu0 %vm585_vm3, %v1097_v35 }
 0x2bd   : > { %1825 = vmatprep.mubr.msk.f32.mxu0 %vm2013_vm1, %v2014_v13 }
 0x37e   : > { %v656_v36 = vpop.f32.mrb[2].mxu1 }
 0x37f   : > { %v1735_v37 = vpop.f32.mrb[3].mxu1  ;;  %v660_v38 = vsel %vm585_vm3, %v656_v36, -inf }
 0x380   : > { %661 = vmax.xlane.f32.xlu1 %v660_v38 }
 0x382   : > { %v824_v39 = vpop.f32.mrb[0].mxu0 }
 0x383   : > { %v1745_v40 = vpop.f32.mrb[1].mxu0  ;;  %v828_v41 = vsel %vm585_vm3, %v824_v39, -inf }
 0x384   : > { %829 = vmax.xlane.f32.xlu0 %v828_v41  ;;  %v1661_v41 = vld [vmem:[%s2419_s7] ss:$0 sm:$0xff] }
 0x387   : > { %v997_v42 = vpop.f32.mrb[2].mxu0 }
 0x388   : > { %v1755_v43 = vpop.f32.mrb[3].mxu0  ;;  %v1001_v44 = vsel %vm585_vm3, %v997_v42, -inf }
 0x389   : > { %1002 = vmax.xlane.f32.xlu1 %v1001_v44 }
 0x38f   : > { %v1170_v45 = vpop.f32.mrb[4].mxu0 }
 0x390   : > { %v1765_v46 = vpop.f32.mrb[5].mxu0  ;;  %v1174_v47 = vsel %vm585_vm3, %v1170_v45, -inf }
 0x391   : > { %1175 = vmax.xlane.f32.xlu0 %v1174_v47 }
 0x39a   : > { %671 = vrot.lane.b32.xlu1 %v2196_v28, %s2022_s25  ;;  %s1643_s25 = sshll.u32 %s456_s24, 3 }
 0x39b   : > { %s458_s2 = scalar_lea.vmem [#allocation4], %s1643_s25  ;;  %s2029_s25 = smov [#allocation4]  }
 0x40d   : > { %v662_v48 = vpop.xlane.xlu1 %661 }
 0x40e   : > { %v663_v49 = vsub.f32 %v656_v36, %v662_v48 }
 0x410   : > { %v664_v50 = vmul.f32 1.442695, %v663_v49 }
 0x411   : > { %v830_v51 = vpop.xlane.xlu0 %829 }
 0x412   : > { %1928 = vpow2.f32 %v664_v50  ;;  %v831_v52 = vsub.f32 %v824_v39, %v830_v51  ;;  %v1382_v51 = vld [vmem:[%s2422_s10] sm:$0xff] }
 0x414   : > { %v832_v53 = vmul.f32 1.442695, %v831_v52 }
 0x416   : > { %1930 = vpow2.f32 %v832_v53  ;;  %v1003_v54 = vpop.xlane.xlu1 %1002  ;;  %v1384_v53 = vld [vmem:[%s2422_s10 + $0x10] sm:$0xff] }
 0x417   : > { %v1004_v55 = vsub.f32 %v997_v42, %v1003_v54  ;;  %v1385_v54 = vld [vmem:[%s2422_s10 + $0x18] sm:$0xff] }
 0x419   : > { %v1005_v56 = vmul.f32 1.442695, %v1004_v55  ;;  %v1844_v55 = vpack.c.bf16 %v1385_v54, %v1384_v53 }
 0x41a   : > { %v672_v57 = vpop.permute.xlu1 %671 }
 0x41b   : > { %1932 = vpow2.f32 %v1005_v56  ;;  %1737 = vmatpush3.msra.mxu1 %v672_v57  ;;  %v1471_v56 = vld [vmem:[%s2424_s12] sm:$0xff]  ;;  %v1472_v57 = vld [vmem:[%s2424_s12 + $0x8] sm:$0xff] }
 0x41c   : > { %v1929_v58 = vpop.eup %1928  ;;  %1746 = vmatprep.subr.mxu1 %v2014_v13 }
 0x41d   : > { %v666_v59 = vsel %vm585_vm3, %v1929_v58, 0.0 }
 0x41e   : > { %v1176_v60 = vpop.xlane.xlu0 %1175  ;;  %667 = vadd.xlane.f32.xlu1 %v666_v59  ;;  %v1847_v59 = vpack.c.bf16 %v1472_v57, %v1471_v56 }
 0x41f   : > { %v1177_v61 = vsub.f32 %v1170_v45, %v1176_v60  ;;  %v1474_v60 = vld [vmem:[%s2424_s12 + $0x18] sm:$0xff] }
 0x420   : > { %v1931_v62 = vpop.eup %1930  ;;  %1848 = vmatpush3.bf16.msra.mxu0 %v1847_v59 }
 0x421   : > { %v1178_v63 = vmul.f32 1.442695, %v1177_v61  ;;  %v834_v1 = vsel %vm585_vm3, %v1931_v62, 0.0  ;;  %1849 = vmatprep.subr.bf16.mxu0 %v2012_v10 }
 0x422   : > { %835 = vadd.xlane.f32.xlu0 %v834_v1 }
 0x423   : > { %1934 = vpow2.f32 %v1178_v63  ;;  %v1476_v63 = vld [vmem:[%s2424_s12 + $0x28] sm:$0xff] }
 0x425   : > { %v1933_v2 = vpop.eup %1932 }
 0x426   : > { %v1007_v3 = vsel %vm585_vm3, %v1933_v2, 0.0 }
 0x427   : > { %1008 = vadd.xlane.f32.xlu1 %v1007_v3 }
 0x42d   : > { %v1935_v4 = vpop.eup %1934 }
 0x42e   : > { %v1180_v5 = vsel %vm585_vm3, %v1935_v4, 0.0 }
 0x42f   : > { %1181 = vadd.xlane.f32.xlu0 %v1180_v5 }
 0x438   : > { %1012 = vrot.lane.b32.xlu1 %v2196_v28, %s2023_s26  ;;  %s1567_s26 = scalar_lea.sflag [#allocation5], %s456_s24 }
 0x43c   : > { %1185 = vrot.lane.b32.xlu1 %v2196_v28, %s2024_s27  ;;  %s1952_s27 = sshll.u32 %s2029_s25, 4  ;;  %s1953_s27 = int_to_ptr.vmem [resolvable:$false] %s1952_s27 }
 0x43d   : > { %s1954_s3 = scalar_lea.vmem %s1953_s27, 256 }
 0x445   : > { %839 = vrot.lane.b32.xlu0 %v2196_v28, %s2025_s16  ;;  %v1270_v28 = vld [vmem:[%s2418_s6 + $0x10] sm:$0xff]  ;;  %s1580_s16 = sshll.u32 %s458_s2, 4  ;;  %s2371_s16 = int_to_ptr.vmem [resolvable:$true] %s1580_s16 }
 0x446   : > { %v1838_v30 = vpack.c.bf16 %v1271_v29, %v1270_v28  ;;  %v1665_v28 = vld [vmem:[%s2423_s11] ss:$0 sm:$0xff]  ;;  %s1948_s1 = scalar_lea.vmem %s2371_s16, 128  ;;  %p1955_p0 = scmp.lt.s32.totalorder %s2371_s16, %s1953_s27 }
 0x447   : > { %p1949_p11 = scmp.ne.s32.totalorder %s2371_s16, %s1948_s1  ;;  %p1956_p1 = scmp.lt.s32.totalorder %s1954_s3, %s1948_s1 }
 0x449   : > { %p1950_p12 = pnand %p1949_p11, %p2143_p5  ;;  %p1957_p2 = por %p1956_p1, %p1955_p0 }
 0x44b   : > { %p1951_p13 = pneg %p1950_p12 }
 0x44d   : > { %p1958_p3 = pnand %p1957_p2, %p1951_p13 }
 0x4ab   : > { %v668_v6 = vpop.xlane.xlu1 %667 }
 0x4ac   : > { %1936 = vrcp.f32 %v668_v6  ;;  %v1663_v6 = vld [vmem:[%s2420_s8] ss:$0 sm:$0xff] }
 0x4af   : > { %v836_v7 = vpop.xlane.xlu0 %835 }
 0x4b0   : > { %1938 = vrcp.f32 %v836_v7 }
 0x4b4   : > { %v1009_v8 = vpop.xlane.xlu1 %1008 }
 0x4b5   : > { %1940 = vrcp.f32 %v1009_v8  ;;  %v1664_v8 = vld [vmem:[%s2421_s9] ss:$0 sm:$0xff] }
 0x4b6   : > { %v1937_v9 = vpop.eup %1936 }
 0x4b7   : > { %v670_v11 = vmul.f32 %v1937_v9, %v1929_v58  ;;  %v1473_v58 = vld [vmem:[%s2424_s12 + $0x10] sm:$0xff] }
 0x4b8   : > { %v1013_v16 = vpop.permute.xlu1 %1012  ;;  %v1850_v61 = vpack.c.bf16 %v1474_v60, %v1473_v58 }
 0x4b9   : > { %1739 = vmatmul.mubr.msk.f32.vlgmr.msra.gmra.mrb[4].mxu1 %vm585_vm3, %v670_v11 }
 0x4ba   : > { %1748 = vmatprep.mubr.msk.f32.mxu1 %vm2013_vm1, %v2014_v13  ;;  %v1939_v14 = vpop.eup %1938  ;;  %1851 = vmatpush3.bf16.msra.mxu0 %v1850_v61 }
 0x4bb   : > { %v838_v15 = vmul.f32 %v1939_v14, %v1931_v62  ;;  %v1475_v62 = vld [vmem:[%s2424_s12 + $0x20] sm:$0xff]  ;;  %1852 = vmatprep.subr.bf16.mxu0 %v2012_v10  ;;  %v1478_v14 = vld [vmem:[%s2424_s12 + $0x38] sm:$0xff] }
 0x4bc   : > { %v1182_v12 = vpop.xlane.xlu0 %1181  ;;  %v1186_v20 = vpop.permute.xlu1 %1185  ;;  %v1853_v1 = vpack.c.bf16 %v1476_v63, %v1475_v62 }
 0x4bd   : > { %1942 = vrcp.f32 %v1182_v12  ;;  %v1477_v12 = vld [vmem:[%s2424_s12 + $0x30] sm:$0xff] }
 0x4be   : > { %1854 = vmatpush3.bf16.msra.mxu0 %v1853_v1 }
 0x4bf   : > { %v1941_v18 = vpop.eup %1940  ;;  %1855 = vmatprep.subr.bf16.mxu0 %v2012_v10 }
 0x4c0   : > { %v840_v17 = vpop.permute.xlu0 %839  ;;  %v1011_v19 = vmul.f32 %v1941_v18, %v1933_v2 }
 0x4c1   : > { %1747 = vmatpush3.msra.mxu1 %v840_v17  ;;  %v1480_v17 = vld [vmem:[%s2424_s12 + $0x48] sm:$0xff] }
 0x4c2   : > { %1749 = vmatmul.mubr.msk.f32.vlgmr.msra.gmra.mrb[6].mxu1 %vm585_vm3, %v838_v15  ;;  %1756 = vmatprep.subr.mxu1 %v2014_v13  ;;  %v1856_v15 = vpack.c.bf16 %v1478_v14, %v1477_v12 }
 0x4c3   : > { %1757 = vmatpush3.msra.mxu1 %v1013_v16  ;;  %1758 = vmatprep.mubr.msk.f32.mxu1 %vm2013_vm1, %v2014_v13  ;;  %v1479_v16 = vld [vmem:[%s2424_s12 + $0x40] sm:$0xff] }
 0x4c4   : > { %1766 = vmatprep.subr.mxu1 %v2014_v13  ;;  %1857 = vmatpush3.bf16.msra.mxu0 %v1856_v15  ;;  %v1859_v18 = vpack.c.bf16 %v1480_v17, %v1479_v16 }
 0x4c5   : > { %1858 = vmatprep.subr.bf16.mxu0 %v2012_v10 }
 0x4c6   : > { %1759 = vmatmul.mubr.msk.f32.vlgmr.msra.gmra.mrb[8].mxu1 %vm585_vm3, %v1011_v19  ;;  %v1481_v19 = vld [vmem:[%s2424_s12 + $0x50] sm:$0xff] }
 0x4c7   : > { %v1943_v21 = vpop.eup %1942  ;;  %1767 = vmatpush3.msra.mxu1 %v1186_v20  ;;  %1768 = vmatprep.mubr.msk.f32.mxu1 %vm2013_vm1, %v2014_v13  ;;  %v1482_v20 = vld [vmem:[%s2424_s12 + $0x58] sm:$0xff] }
 0x4c8   : > { %v1184_v22 = vmul.f32 %v1943_v21, %v1935_v4  ;;  %1834 = vmatprep.subr.bf16.mxu1 %v2012_v10  ;;  %1860 = vmatpush3.bf16.msra.mxu0 %v1859_v18  ;;  %v1862_v21 = vpack.c.bf16 %v1482_v20, %v1481_v19 }
 0x4c9   : > { %1861 = vmatprep.subr.bf16.mxu0 %v2012_v10 }
 0x4ca   : > { %1769 = vmatmul.mubr.msk.f32.vlgmr.msra.gmra.mrb[10].mxu1 %vm585_vm3, %v1184_v22  ;;  %v1483_v22 = vld [vmem:[%s2424_s12 + $0x60] sm:$0xff] }
 0x4cb   : > { %1779 = vmatprep.mubr.msk.f32.mxu1 %vm2013_vm1, %v2014_v13  ;;  %1836 = vmatpush3.bf16.msra.mxu1 %v1835_v27  ;;  %v1868_v27 = vpack.c.bf16 %v1486_v26, %v1485_v25 }
 0x4cc   : > { %1837 = vmatprep.subr.bf16.mxu1 %v2012_v10  ;;  %1863 = vmatpush3.bf16.msra.mxu0 %v1862_v21 }
 0x4cd   : > { %1864 = vmatprep.subr.bf16.mxu0 %v2012_v10 }
 0x4cf   : > { %1839 = vmatpush3.bf16.msra.mxu1 %v1838_v30 }
 0x4d0   : > { %1840 = vmatprep.subr.bf16.mxu1 %v2012_v10 }
 0x58c   : > { %v743_v23 = vpop.f32.mrb[4].mxu1 }
 0x58d   : > { %747 = vst.msk [vmem:[#allocation3] sm:$0xff] %vm585_vm3, %v743_v23  ;;  %v1740_v24 = vpop.f32.mrb[5].mxu1  ;;  %v1484_v23 = vld [vmem:[%s2424_s12 + $0x68] sm:$0xff] }
 0x58e   : > { %v1865_v24 = vpack.c.bf16 %v1484_v23, %v1483_v22 }
 0x590   : > { %1866 = vmatpush3.bf16.msra.mxu0 %v1865_v24 }
 0x591   : > { %1867 = vmatprep.subr.bf16.mxu0 %v2012_v10 }
 0x594   : > { %1869 = vmatpush3.bf16.msra.mxu0 %v1868_v27 }
 0x595   : > { %v911_v31 = vpop.f32.mrb[6].mxu1 }
 0x596   : > { %916 = vrot.lane.b32.xlu0 %v911_v31, %s2026_s18  ;;  %v1750_v32 = vpop.f32.mrb[7].mxu1 }
 0x599   : > { %v1084_v33 = vpop.f32.mrb[8].mxu1 }
 0x59a   : > { %1089 = vrot.lane.b32.xlu1 %v1084_v33, %s2027_s19  ;;  %v1760_v34 = vpop.f32.mrb[9].mxu1 }
 0x59d   : > { %v1257_v35 = vpop.f32.mrb[10].mxu1 }
 0x59e   : > { %1262 = vrot.lane.b32.xlu0 %v1257_v35, %s2028_s23  ;;  %v1770_v36 = vpop.f32.mrb[11].mxu1  ;;  %s2369_s23 = scalar_lea.hbm %s2426_s14, %s1669_s0 }
 0x59f   : > { %v1667_v36 = vld [vmem:[%s2425_s13] ss:$0 sm:$0xff] }
 0x608   : > { %v917_v37 = vpop.permute.xlu0 %916 }
 0x609   : > { %920 = vst.msk [vmem:[#allocation3] sm:$0xff] %vm919_vm4, %v917_v37 }
 0x60c   : > { %v1090_v38 = vpop.permute.xlu1 %1089 }
 0x60d   : > { %1093 = vst.msk [vmem:[#allocation3] sm:$0xff] %vm1092_vm5, %v1090_v38 }
 0x610   : > { %v1263_v39 = vpop.permute.xlu0 %1262 }
 0x611   : > { %1266 = vst.msk [vmem:[#allocation3] sm:$0xff] %vm1265_vm6, %v1263_v39 }
 0x618   : > { %v1267_v40 = vld [vmem:[#allocation3] sm:$0xff] }
 0x619   : > { %1780 = vmatmul.mubr.msk.f32.vlgmr.msra.gmra.mrb[12].mxu1 %vm466_vm0, %v1267_v40 }
 0x61a   : > { %1790 = vmatprep.mubr.msk.f32.mxu1 %vm2013_vm1, %v2014_v13 }
 0x6ec   : > { %v1348_v42 = vpop.f32.mrb[12].mxu1 }
 0x6ed   : > { %v1349_v43 = vadd.f32 %v1661_v41, %v1348_v42  ;;  %v1781_v44 = vpop.f32.mrb[13].mxu1 }
 0x6ef   : > { %v2276_v45 = vadd.f32 %v1349_v43, %v2158_v0  ;;  %v1383_v0 = vld [vmem:[%s2422_s10 + $0x8] sm:$0xff] }
 0x6f0   : > { %v1841_v52 = vpack.c.bf16 %v1383_v0, %v1382_v51 }
 0x6f1   : > { %v1355_v46 = vsel %vm466_vm0, %v2276_v45, 0.0 }
 0x6f2   : > { %1356 = vadd.xlane.f32.xlu1 %v1355_v46  ;;  %1842 = vmatpush3.bf16.msra.mxu1 %v1841_v52 }
 0x6f3   : > { %1843 = vmatprep.subr.bf16.mxu1 %v2012_v10 }
 0x6f6   : > { %1845 = vmatpush3.bf16.msra.mxu1 %v1844_v55 }
 0x77f   : > { %v1357_v47 = vpop.xlane.xlu1 %1356 }
 0x780   : > { %v1358_v48 = vmul.f32 0.03125, %v1357_v47 }
 0x782   : > { %v1359_v49 = vsub.f32 %v2276_v45, %v1358_v48 }
 0x784   : > { %v1360_v50 = vmul.f32 %v1359_v49, %v1359_v49 }
 0x786   : > { %v1361_v13 = vsel %vm466_vm0, %v1360_v50, 0.0 }
 0x787   : > { %1362 = vadd.xlane.f32.xlu0 %v1361_v13 }
 0x814   : > { %v1363_v2 = vpop.xlane.xlu0 %1362 }
 0x815   : > { %v1364_v3 = vmul.f32 0.03125, %v1363_v2 }
 0x817   : > { %v1365_v4 = vadd.f32 1e-05, %v1364_v3 }
 0x819   : > { %1944 = vrsqrt.f32 %v1365_v4 }
 0x823   : > { %v1945_v5 = vpop.eup %1944 }
 0x824   : > { %v1367_v7 = vmul.f32 %v1945_v5, %v1359_v49 }
 0x826   : > { %v1374_v9 = vmul.f32 %v1663_v6, %v1367_v7 }
 0x828   : > { %v1381_v11 = vadd.f32 %v1664_v8, %v1374_v9 }
 0x82a   : > { %1791 = vmatmul.mubr.msk.f32.vlgmr.msra.gmra.mrb[14].mxu1 %vm466_vm0, %v1381_v11 }
 0x8fd   : > { %v1462_v29 = vpop.f32.mrb[14].mxu1 }
 0x8fe   : > { %v1463_v30 = vadd.f32 %v1665_v28, %v1462_v29  ;;  %v1792_v31 = vpop.f32.mrb[15].mxu1 }
 0x900   : > { %v1467_v10 = vmul.f32 0.70710677, %v1463_v30  ;;  %v1466_v33 = vmul.f32 0.5, %v1463_v30 }
 0x902   : > { %1946 = verf.f32 %v1467_v10 }
 0x90c   : > { %v1947_v32 = vpop.eup %1946 }
 0x90d   : > { %v1469_v34 = vadd.f32 1.0, %v1947_v32 }
 0x90f   : > { %v1470_v35 = vmul.f32 %v1469_v34, %v1466_v33 }
 0x911   : > { %1826 = vmatmul.mubr.f32.vlgmr.msra.gmra.mrb[6].mxu0 %v1470_v35 }
 0x9e4   : > { %v1560_v37 = vpop.f32.mrb[6].mxu0 }
 0x9e5   : > { %v1561_v38 = vadd.f32 %v1667_v36, %v1560_v37  ;;  %v1827_v39 = vpop.f32.mrb[7].mxu0 }
 0x9e7   : > { %v1564_v40 = vadd.f32 %v1561_v38, %v2276_v45 }
 0x9e9   : > { %1565 = vst.msk [vmem:[%s458_s2] sm:$0xff] %vm466_vm0, %v1564_v40 }
 0x9ea   : > { %1961 = shalt.err (!%p1958_p3)
}
 0x9eb   : > { %s1962_s24 = scalar_lea.hbm %s2369_s23, 128  ;;  %s1966_s18 = scalar_lea.hbm %s2426_s14, 256 }
 0x9ec   : > { %p1963_p4 = scmp.ne.s32.totalorder %s2369_s23, %s1962_s24  ;;  %p1967_p9 = scmp.lt.u32.totalorder %s2369_s23, %s2426_s14 }
 0x9ed   : > { %p1968_p10 = scmp.lt.u32.totalorder %s1966_s18, %s1962_s24  ;;  %p1970_p12 = scmp.lt.u32.totalorder %s1962_s24, %s2369_s23 }
 0x9ee   : > { %p1964_p7 = pnand %p1963_p4, %p2143_p5 }
 0x9ef   : > { %p1969_p11 = por %p1968_p10, %p1967_p9 }
 0x9f0   : > { %p1965_p8 = pneg %p1964_p7 }
 0x9f1   : > { %p1971_p13 = por %p1970_p12, %p1969_p11 }
 0x9f3   : > { %p1972_p0 = pnand %p1971_p13, %p1965_p8 }
 0x9f5   : > { %1975 = shalt.err (!%p1972_p0)
}
 0x9f6   : > { %1870 = dma.vmem_to_hbm [thread:$0]  (%p2143_p5), %s2371_s16, 128, %s2369_s23, %s1567_s26  }
 0x9f7 PF: > { %p1876_p1 = scmp.ge.s32.totalorder %s2010_s15, 2  ;;  %s1592_s3 = sand.u32 1, %s1998_s28  }
 0x9f8   : > { %s1593_s1 = scalar_lea.sflag [#allocation5], %s1592_s3 }
 0x9f9   : > { %p1873_p2 = pnand %p1876_p1, %p2147_p6 }
 0x9fb   : > { %1993 = dma.done.wait (!%p1873_p2), %s1593_s1, 128  }
 0x9fc   : > { %1995 = vsyncadd (!%p1873_p2), %s1593_s1, 4294967168  ;;  %p24_p3 = scmp.ge.s32.totalorder %s2130_s17, 4   ;;  %s2435_s28 = smov %s2002_s29 }
 0x9fd   : > { %s2436_s29 = smov %s2006_s30  ;;  %s2437_s30 = smov %s2141_s20 }
 0x9fe   : > { %s2438_s15 = smov %s2130_s17  ;;  %26 = sbr.rel (!%p24_p3) target bundleno = 7 (0x7), region = 111 }
 0xa05   :  { %1598 = vsyncpa [#allocation5], 1 }
 0xa06   :  { %1600 = vsyncpa [#allocation5 + $0x1], 1 }

</bundles_post_ra>
